<compile_context>
chip_gen: v6e
topology: v6e:2x2x1
jax: 0.10.0
libtpu: 0.0.40
codegen_flags: <defaults>
</compile_context>

<pallas_src>
import jax
import jax.numpy as jnp
from jax import lax
from jax.experimental import pallas as pl
from jax.experimental.pallas import tpu as pltpu

_MIB = 1024 * 1024


# ----------------------------------------------------------------------------
# Sizing helpers
# ----------------------------------------------------------------------------
def _tpu_vmem_capacity_bytes() -> int:
    """Physical VMEM per TensorCore; conservative 64 MiB fallback (v7x)."""
    try:
        get_info = getattr(pltpu, "get_tpu_info", None)
        if get_info is not None:
            cap = getattr(get_info(), "vmem_capacity_bytes", None)
            if cap:
                return int(cap)
    except Exception:
        pass
    return 64 * _MIB


def _auto_limits(weight_bytes_double_buffered: int, user_vmem_limit):
    """(vmem_limit_bytes, per-streamed-tile byte budget) for this chip."""
    cap = _tpu_vmem_capacity_bytes()
    if cap >= 128 * _MIB:                       # v5e / v6e: 128 MiB physical
        vmem_limit = min(96 * _MIB, (cap * 3) // 4)
        tile_cap = 20 * _MIB
    else:                                       # v7x (64 MiB / TC) or unknown
        vmem_limit = min(48 * _MIB, (cap * 3) // 4)
        tile_cap = 8 * _MIB
    if user_vmem_limit is not None:
        vmem_limit = int(user_vmem_limit)
    headroom = vmem_limit - weight_bytes_double_buffered - 2 * _MIB
    budget = min(tile_cap, max(512 * 1024, headroom // 2))   # x2 double-buffer
    return vmem_limit, budget


def _pick_batch_tile(B: int, max_tb: int) -> int:
    """Largest legal batch tile, preferring >= 2 (ideally even #) grid steps.

    Legality: tb divides B and (tb % 8 == 0 or tb == B) so the (tb, ...)
    output / token-0 blocks satisfy the sublane constraint.  >= 2 tiles keeps
    both v7x TensorCores busy on the 'parallel' batch axis.
    """
    valid = [tb for tb in range(min(B, max_tb), 0, -1)
             if B % tb == 0 and (tb % 8 == 0 or tb == B)]
    if not valid:
        return B
    for want_even in (True, False):
        for tb in valid:
            n = B // tb
            if n >= 2 and (n % 2 == 0 or not want_even):
                return tb
    return valid[0]


def _pick_seq_tile(S: int, tb: int, d_in: int, itemsize: int, budget: int):
    """(ts, needs_mask): streamed seq tile under the VMEM budget."""
    sub = 16 if itemsize < 4 else 8             # sublane packing (bf16: 16 rows)
    bytes_per_row = max(1, tb * d_in * itemsize)
    ts = (budget // bytes_per_row) // sub * sub
    ts = max(sub, ts)
    if ts >= S:
        return S, False                          # full-dim block is always legal
    return ts, (S % ts != 0)


# ----------------------------------------------------------------------------
# Kernels
# ----------------------------------------------------------------------------
def _first_kernel(h0_ref, w1t_ref, w2_ref, b2_ref, o_ref):
    """pool_type == 'first': token0 -> dense1 -> relu -> dense2 + bias."""
    x = h0_ref[...]                                               # [tb, Din]
    k = jnp.dot(x, w1t_ref[...], preferred_element_type=jnp.float32)
    pooled = jnp.maximum(k, 0.0)                                  # [tb, Dout] f32
    w2 = w2_ref[...].astype(jnp.float32)                          # [1, Dout]
    logits = jnp.sum(pooled * w2, axis=-1, keepdims=True) + b2_ref[0]
    o_ref[...] = logits.astype(o_ref.dtype)                       # [tb, 1]


def _make_pool_kernel(pool_type: str, seq_len: int, needs_mask: bool):
    """pool_type in ('mean', 'max'): streamed over S tiles with f32 accum."""

    def kernel(h_ref, w1t_ref, w2_ref, b2_ref, o_ref, acc_ref):
        j = pl.program_id(1)

        @pl.when(j == 0)
        def _init():
            if pool_type == "max":
                # -inf identity: correct independent of the activation.
                acc_ref[...] = jnp.full(acc_ref.shape, -jnp.inf, acc_ref.dtype)
            else:
                acc_ref[...] = jnp.zeros(acc_ref.shape, acc_ref.dtype)

        tb, ts, d_in = h_ref.shape
        x = h_ref[...].reshape(tb * ts, d_in)                     # 2-D matmul M
        k = jnp.dot(x, w1t_ref[...], preferred_element_type=jnp.float32)
        k = jnp.maximum(k, 0.0).reshape(tb, ts, -1)               # [tb, ts, Dout]

        if needs_mask:
            # cdiv grid: the tail tile overhangs S; mask the padded rows.
            row = j * ts + lax.broadcasted_iota(jnp.int32, (1, ts, 1), 1)
            fill = -jnp.inf if pool_type == "max" else 0.0
            k = jnp.where(row < seq_len, k, jnp.float32(fill))

        if pool_type == "mean":
            acc_ref[...] += jnp.sum(k, axis=1)
        else:  # 'max'
            acc_ref[...] = jnp.maximum(acc_ref[...], jnp.max(k, axis=1))

        @pl.when(j == pl.num_programs(1) - 1)
        def _finalize():
            pooled = acc_ref[...]
            if pool_type == "mean":
                pooled = pooled * jnp.float32(1.0 / seq_len)      # true S
            w2 = w2_ref[...].astype(jnp.float32)                  # [1, Dout]
            logits = jnp.sum(pooled * w2, axis=-1, keepdims=True) + b2_ref[0]
            o_ref[...] = logits.astype(o_ref.dtype)               # [tb, 1]

    return kernel


# ----------------------------------------------------------------------------
# Wrapper
# ----------------------------------------------------------------------------
def has_answer_head(hidden_states, w1, w2, b2, pool_type: str = "first", *,
                    cast_f32_to_bf16: bool = True,
                    batch_tile=None, seq_tile=None, vmem_limit_bytes=None):
    """Pallas implementation of HasAnswerHead.forward.

    hidden_states : [B, S, D]   (float dtype)
    w1            : [D, D]      torch Linear layout [out, in], no bias
    w2            : [1, D]      torch Linear layout
    b2            : [1]
    returns       : [B, 1] in hidden_states.dtype
    """
    B, S, D_in = hidden_states.shape
    D_out, d_in_w = w1.shape
    assert d_in_w == D_in and w2.shape == (1, D_out)

    if pool_type not in ("first", "mean", "max"):
        raise ValueError(f"Invalid has_answer_pool_type: {pool_type}")

    orig_dtype = hidden_states.dtype
    compute_dtype = (jnp.bfloat16
                     if (cast_f32_to_bf16 and orig_dtype == jnp.float32)
                     else orig_dtype)
    itemsize = jnp.dtype(compute_dtype).itemsize

    # One wrapper-side transpose of dense1 -> standard contraction in-kernel
    # (no per-grid-step XLU transpose of the resident weight).
    w1t = jnp.asarray(w1).T.astype(compute_dtype)          # [Din, Dout]
    w2c = jnp.asarray(w2).astype(compute_dtype)            # [1, Dout]
    b2c = jnp.asarray(b2).reshape((1,)).astype(jnp.float32)

    out_shape = jax.ShapeDtypeStruct((B, 1), orig_dtype)
    smem_spec = pl.BlockSpec(memory_space=pltpu.MemorySpace.SMEM)

    weight_bytes_db = 2 * (w1t.size + w2c.size) * itemsize   # default 2 buffers
    vmem_limit, tile_budget = _auto_limits(weight_bytes_db, vmem_limit_bytes)

    if batch_tile is not None:
        tb = int(batch_tile)
        if B % tb != 0 or (tb % 8 != 0 and tb != B):
            raise ValueError("batch_tile must divide B and be a multiple of 8 "
                             "(or equal B)")
    else:
        tb = _pick_batch_tile(B, 256 if pool_type == "first" else 64)

    if pool_type == "first":
        # Only token 0 is used: slice before the kernel so just [B, Din]
        # (not [B, S, Din]) crosses HBM -> VMEM.
        h0 = hidden_states[:, 0, :].astype(compute_dtype)
        grid_spec = pltpu.PrefetchScalarGridSpec(
            num_scalar_prefetch=0,
            grid=(B // tb,),
            in_specs=[
                pl.BlockSpec((tb, D_in), lambda i: (i, 0)),
                pl.BlockSpec((D_in, D_out), lambda i: (0, 0)),   # resident
                pl.BlockSpec((1, D_out), lambda i: (0, 0)),      # resident
                smem_spec,
            ],
            out_specs=pl.BlockSpec((tb, 1), lambda i: (i, 0)),
        )
        return pl.pallas_call(
            _first_kernel,
            out_shape=out_shape,
            grid_spec=grid_spec,
            compiler_params=pltpu.CompilerParams(
                dimension_semantics=("parallel",),
                vmem_limit_bytes=vmem_limit),
        )(h0, w1t, w2c, b2c)

    # ---- mean / max: stream the sequence axis -------------------------------
    hs = hidden_states.astype(compute_dtype)

    if seq_tile is not None:
        ts = min(int(seq_tile), S)
        if ts != S and ts % 8 != 0:
            raise ValueError("seq_tile must be a multiple of 8 (or >= S)")
    else:
        ts, _ = _pick_seq_tile(S, tb, D_in, itemsize, tile_budget)
    needs_mask = (S % ts != 0)

    grid_spec = pltpu.PrefetchScalarGridSpec(
        num_scalar_prefetch=0,
        grid=(B // tb, pl.cdiv(S, ts)),                  # reduction (S) axis last
        in_specs=[
            pl.BlockSpec((tb, ts, D_in), lambda i, j: (i, j, 0)),
            pl.BlockSpec((D_in, D_out), lambda i, j: (0, 0)),    # resident
            pl.BlockSpec((1, D_out), lambda i, j: (0, 0)),       # resident
            smem_spec,
        ],
        out_specs=pl.BlockSpec((tb, 1), lambda i, j: (i, 0)),
        scratch_shapes=[pltpu.VMEM((tb, D_out), jnp.float32)],   # running pool
    )
    return pl.pallas_call(
        _make_pool_kernel(pool_type, S, needs_mask),
        out_shape=out_shape,
        grid_spec=grid_spec,
        compiler_params=pltpu.CompilerParams(
            dimension_semantics=("parallel", "arbitrary"),
            vmem_limit_bytes=vmem_limit),
    )(hs, w1t, w2c, b2c)


# ----------------------------------------------------------------------------
# Pure-JAX reference (mirrors the PyTorch forward) and self-test
# ----------------------------------------------------------------------------
def _reference(hidden_states, w1, w2, b2, pool_type: str = "first"):
    hs = hidden_states.astype(jnp.float32)
    w1 = w1.astype(jnp.float32)
    w2 = w2.astype(jnp.float32)
    b2 = b2.astype(jnp.float32)
    if pool_type == "first":
        h = jax.nn.relu(hs[:, 0] @ w1.T)
    elif pool_type == "mean":
        h = jnp.mean(jax.nn.relu(hs @ w1.T), axis=1)
    elif pool_type == "max":
        h = jnp.max(jax.nn.relu(hs @ w1.T), axis=1)
    else:
        raise ValueError(pool_type)
    return h @ w2.T + b2


if __name__ == "__main__":
    B, S, D = 2, 8, 32  # batch, seq, d_model

    key = jax.random.PRNGKey(0)
    k_h, k_w1, k_w2, k_b2 = jax.random.split(key, 4)

    hidden_states = jax.random.normal(k_h, (B, S, D), dtype=jnp.float32)
    # Deterministic synthetic parameters (torch Linear layout, no checkpoint).
    w1 = jax.random.normal(k_w1, (D, D), dtype=jnp.float32) * 0.05   # dense1
    w2 = jax.random.normal(k_w2, (1, D), dtype=jnp.float32) * 0.05   # dense2 w
    b2 = jax.random.normal(k_b2, (1,), dtype=jnp.float32) * 0.05     # dense2 b

    ok = True

    # Exact f32 data path (bf16 cast disabled): tight tolerance.
    for pool_type in ("first", "mean", "max"):
        out = jax.block_until_ready(
            has_answer_head(hidden_states, w1, w2, b2, pool_type,
                            cast_f32_to_bf16=False))
        ref = _reference(hidden_states, w1, w2, b2, pool_type)
        if out.shape != (B, 1) or not jnp.allclose(out, ref, atol=1e-4, rtol=1e-4):
            ok = False
            print(f"MISMATCH for pool_type={pool_type} (f32 exact)")

    # Default path: f32 inputs -> bf16 data path, f32 accumulation, f32 output.
    for pool_type in ("first", "mean", "max"):
        out = jax.block_until_ready(
            has_answer_head(hidden_states, w1, w2, b2, pool_type))
        ref = _reference(hidden_states, w1, w2, b2, pool_type)
        if (out.shape != (B, 1) or out.dtype != jnp.float32
                or not jnp.allclose(out, ref, atol=2e-2, rtol=2e-2)):
            ok = False
            print(f"MISMATCH for pool_type={pool_type} (bf16 data path)")

    # bf16 inputs end-to-end.
    hs_bf = hidden_states.astype(jnp.bfloat16)
    w1_bf = w1.astype(jnp.bfloat16)
    w2_bf = w2.astype(jnp.bfloat16)
    for pool_type in ("first", "mean"):
        out = jax.block_until_ready(
            has_answer_head(hs_bf, w1_bf, w2_bf, b2, pool_type))
        ref = _reference(hs_bf, w1_bf, w2_bf, b2, pool_type)
        if out.shape != (B, 1) or not jnp.allclose(
                out.astype(jnp.float32), ref, atol=2e-2, rtol=2e-2):
            ok = False
            print(f"MISMATCH for pool_type={pool_type} (bf16 inputs)")

    # Ragged S (no ts divisor): exercises the cdiv grid + masked tail tile.
    S2 = 40
    hs2 = jax.random.normal(k_h, (B, S2, D), dtype=jnp.float32)
    for pool_type in ("mean", "max"):
        out = jax.block_until_ready(
            has_answer_head(hs2, w1, w2, b2, pool_type,
                            cast_f32_to_bf16=False, seq_tile=16))
        ref = _reference(hs2, w1, w2, b2, pool_type)
        if out.shape != (B, 1) or not jnp.allclose(out, ref, atol=1e-4, rtol=1e-4):
            ok = False
            print(f"MISMATCH for pool_type={pool_type} (ragged S, masked tail)")

    if ok:
        print("KERNEL_OK")
</pallas_src>

<mosaic_0001>
module attributes {stable_mosaic.version = 11 : i64} {
  func.func @_first_kernel(%arg0: i32, %arg1: memref<2x32xf32, #tpu.memory_space<vmem>>, %arg2: memref<32x32xf32, #tpu.memory_space<vmem>>, %arg3: memref<1x32xf32, #tpu.memory_space<vmem>>, %arg4: memref<1xf32, #tpu.memory_space<smem>>, %arg5: memref<2x1xf32, #tpu.memory_space<vmem>>) attributes {dimension_semantics = [#tpu.dimension_semantics<parallel>], iteration_bounds = array<i64: 1>, scalar_prefetch = 0 : i64, scratch_operands = 0 : i64, tpu.core_type = #tpu.core_type<tc>, window_params = [{transform_indices = @transform_0, window_bounds = array<i64: 2, 32>}, {pipeline_mode = #tpu.pipeline_mode<synchronous>, transform_indices = @transform_1, window_bounds = array<i64: 32, 32>}, {pipeline_mode = #tpu.pipeline_mode<synchronous>, transform_indices = @transform_2, window_bounds = array<i64: 1, 32>}, {transform_indices = @transform_3, window_bounds = array<i64: 1>}, {transform_indices = @transform_4, window_bounds = array<i64: 2, 1>}]} {
    %c0 = arith.constant 0 : index
    %c0_0 = arith.constant 0 : index
    %0 = vector.load %arg1[%c0, %c0_0] : memref<2x32xf32, #tpu.memory_space<vmem>>, vector<2x32xf32>
    %c0_1 = arith.constant 0 : index
    %c0_2 = arith.constant 0 : index
    %1 = vector.load %arg2[%c0_1, %c0_2] : memref<32x32xf32, #tpu.memory_space<vmem>>, vector<32x32xf32>
    %cst = arith.constant dense<0.000000e+00> : vector<2x32xf32>
    %2 = tpu.matmul %0, %1, %cst {dimension_numbers = #tpu.dot_dimension_numbers<[1], [0], [0], [1], [0, 0, 1, 1], [], []>} : vector<2x32xf32>, vector<32x32xf32>, vector<2x32xf32> -> vector<2x32xf32>
    %cst_3 = arith.constant 0.000000e+00 : f32
    %3 = vector.broadcast %cst_3 : f32 to vector<2x32xf32>
    %4 = arith.maximumf %2, %3 : vector<2x32xf32>
    %c0_4 = arith.constant 0 : index
    %c0_5 = arith.constant 0 : index
    %5 = vector.load %arg3[%c0_4, %c0_5] : memref<1x32xf32, #tpu.memory_space<vmem>>, vector<1x32xf32>
    %6 = vector.broadcast %5 : vector<1x32xf32> to vector<2x32xf32>
    %7 = arith.mulf %4, %6 : vector<2x32xf32>
    %cst_6 = arith.constant dense<0.000000e+00> : vector<2xf32>
    %8 = vector.multi_reduction <add>, %7, %cst_6 [1] : vector<2x32xf32> to vector<2xf32>
    %9 = vector.shape_cast %8 : vector<2xf32> to vector<2x1xf32>
    %c0_7 = arith.constant 0 : index
    %10 = memref.load %arg4[%c0_7] : memref<1xf32, #tpu.memory_space<smem>>
    %11 = vector.broadcast %10 : f32 to vector<2x1xf32>
    %12 = arith.addf %9, %11 : vector<2x1xf32>
    %c0_8 = arith.constant 0 : index
    %c0_9 = arith.constant 0 : index
    %13 = vector.load %arg5[%c0_8, %c0_9] : memref<2x1xf32, #tpu.memory_space<vmem>>, vector<2x1xf32>
    tpu.vector_store %arg5[%c0_8, %c0_9], %12 {strides = array<i32>} : memref<2x1xf32, #tpu.memory_space<vmem>>, vector<2x1xf32>,
    return
  }
  func.func @transform_0(%arg0: i32) -> (i32, i32) {
    %c0_i32 = arith.constant 0 : i32
    %c0_i32_0 = arith.constant 0 : i32
    return %arg0, %c0_i32 : i32, i32
  }
  func.func @transform_1(%arg0: i32) -> (i32, i32) {
    %c0_i32 = arith.constant 0 : i32
    %c0_i32_0 = arith.constant 0 : i32
    %c0_i32_1 = arith.constant 0 : i32
    return %c0_i32, %c0_i32_0 : i32, i32
  }
  func.func @transform_2(%arg0: i32) -> (i32, i32) {
    %c0_i32 = arith.constant 0 : i32
    %c0_i32_0 = arith.constant 0 : i32
    %c0_i32_1 = arith.constant 0 : i32
    return %c0_i32, %c0_i32_0 : i32, i32
  }
  func.func @transform_3(%arg0: i32) -> i32 {
    %c0_i32 = arith.constant 0 : i32
    %c0_i32_0 = arith.constant 0 : i32
    return %c0_i32 : i32
  }
  func.func @transform_4(%arg0: i32) -> (i32, i32) {
    %c0_i32 = arith.constant 0 : i32
    %c0_i32_0 = arith.constant 0 : i32
    return %arg0, %c0_i32 : i32, i32
  }
}

</mosaic_0001>

<bundles_post_ra>
// kernel: tpu_custom_call.1
= control target key start
LH: loop header
LB: loop body
LE: loop exit
PB: predicated region body
PF: predicated region fallthrough
CT: control target
= control target key end

     0   :  { %10 = vsyncpa [#allocation4], 0  ;;  %s179_s15 = smov [#allocation3]   ;;  %s224_s0 = inlined_call_operand.vmem [shape: f32[2,32], index: 0, kind: input, shape index: {}]   ;;  %s225_s1 = inlined_call_operand.hbm [shape: f32[32,32], index: 1, kind: input, shape index: {}]   ;;  %s226_s2 = inlined_call_operand.vmem [shape: f32[1,32], index: 2, kind: input, shape index: {}]   ;;  %s227_s3 = inlined_call_operand.<no memory space> [shape: f32[1], index: 3, kind: input, shape index: {}]   ;;  %s228_s4 = inlined_call_operand.vmem [shape: f32[2,1], index: 4, kind: output, shape index: {}]  }
   0x1   :  { %s18_s16 = sshll.u32 %s179_s15, 4  ;;  %s19_s16 = int_to_ptr.vmem [resolvable:$true] %s18_s16 }
   0x2   :  { %s165_s17 = scalar_lea.vmem %s19_s16, 512  ;;  %p170_p1 = scmp.lt.s32.totalorder %s19_s16, %s19_s16 }
   0x3   :  { %p166_p0 = scmp.ne.s32.totalorder %s19_s16, %s165_s17  ;;  %p171_p2 = scmp.lt.s32.totalorder %s165_s17, %s165_s17 }
   0x5   :  { %p172_p3 = por %p171_p2, %p170_p1 }
   0x7   :  { %p173_p4 = pnand %p172_p3, %p166_p0 }
   0x9   :  { %176 = shalt.err (!%p173_p4)
}
   0xa   :  { %s180_s18 = smov 128   ;;  %s181_s19 = smov 8  }
   0xb   :  { %24 = dma.hbm_to_vmem [thread:$0]  %s225_s1, 512, %s19_s16, [#allocation4], %s180_s18, %s180_s18, %s181_s19  }
   0xc   :  { %177 = dma.done.wait [#allocation4], 512  }
   0xd   :  { %178 = vsyncadd [#allocation4], 4294966784  ;;  %v182_v0 = vmov 0.0   ;;  %vm183_vm0 = vmmov 0   ;;  %v36_v1 = vld [vmem:[#allocation3 + $0x18] sm:$0xff]  ;;  %v35_v2 = vld [vmem:[#allocation3 + $0x10] sm:$0xff]  ;;  %v125_v12 = vstv %s227_s3 }
   0xe   :  { %141 = vmatprep.subr.mxu0 %v182_v0  ;;  %149 = vmatprep.mubr.msk.f32.mxu0 %vm183_vm0, %v182_v0  ;;  %v34_v3 = vld [vmem:[#allocation3 + $0x8] sm:$0xff]  ;;  %v33_v4 = vld [vmem:[#allocation3] sm:$0xff]  ;;  %vm37_vm1 = vcmask 261120   ;;  %vm120_vm2 = vcmask 254976   ;;  %vm127_vm3 = vcmask 1024  }
   0xf   :  { %142 = vmatpush3.msra.mxu0 %v36_v1  ;;  %v32_v5 = vld [vmem:[%s224_s0] sm:$0x3] }
  0x10   :  { %143 = vmatprep.subr.mxu0 %v182_v0  ;;  %v135_v7 = vld [vmem:[%s226_s2] ss:$0 sm:$0xff] }
  0x11   :  { %144 = vmatpush3.msra.mxu0 %v35_v2 }
  0x12   :  { %145 = vmatprep.subr.mxu0 %v182_v0 }
  0x13   :  { %146 = vmatpush3.msra.mxu0 %v34_v3 }
  0x14   :  { %147 = vmatprep.subr.mxu0 %v182_v0 }
  0x15   :  { %148 = vmatpush3.msra.mxu0 %v33_v4 }
  0x16   :  { %150 = vmatmul.mubr.msk.f32.vlgmr.msra.gmra.mxu0 %vm37_vm1, %v32_v5 }
  0xd6   :  { %v107_v6 = vpop.f32.mrf.mxu0 }
  0xd7   :  { %v111_v8 = vmax.f32 %v107_v6, 0.0 }
  0xd8   :  { %v151_v9 = vpop.f32.mrf.mxu0 }
  0xd9   :  { %v119_v10 = vmul.f32 %v135_v7, %v111_v8 }
  0xdb   :  { %v121_v11 = vsel %vm120_vm2, %v119_v10, 0.0 }
  0xdc   :  { %122 = vadd.xlane.f32.xlu0 %v121_v11 }
 0x165   :  { %v123_v13 = vpop.xlane.xlu0 %122 }
 0x166   :  { %v126_v14 = vadd.f32 %v125_v12, %v123_v13 }
 0x168   :  { %128 = vst.msk [vmem:[%s228_s4] sm:$0x3] %vm127_vm3, %v126_v14 }
 0x169   :  { %133 = vsyncpa [#allocation4], 1 }

</bundles_post_ra>
